<compile_context>
chip_gen: v5e
topology: v5e:2x2
jax: 0.10.0
libtpu: 0.0.40
codegen_flags: <defaults>
</compile_context>

<pallas_src>
import functools

import jax
import jax.numpy as jnp
from jax.experimental import pallas as pl
from jax.experimental.pallas import tpu as pltpu


@functools.lru_cache(maxsize=None)
def _tpu_vmem_capacity_bytes() -> int:
    """Physical VMEM capacity (bytes); conservative fallback if unavailable."""
    try:
        cap = int(pltpu.get_tpu_info().vmem_capacity_bytes)
        if cap > 0:
            return cap
    except Exception:
        pass
    return 64 * 1024 * 1024  # assume the smallest (v7x-like) part


def _loss_kernel(hp_ref, p_ref, out_ref, *, n_rows: int, tm: int,
                 fold_lanes: bool, accumulate: bool):
    """Fold one (tm, D) tile of (hat_p - p)**2 into an (8, out_w) slab."""
    i = pl.program_id(0)
    last = pl.num_programs(0) - 1
    d = hp_ref.shape[-1]

    if accumulate:
        @pl.when(i == 0)
        def _init():
            out_ref[...] = jnp.zeros_like(out_ref)

    # Cast in-kernel so narrow input dtypes (bf16, ...) don't cost f32 HBM.
    diff = hp_ref[...].astype(jnp.float32) - p_ref[...].astype(jnp.float32)

    def fold(x):
        sq = x * x
        # Row fold: (tm, d) -> (tm//8, 8, d) is layout-free (each (8, d) slab
        # is already a row of vregs); sum(axis=0) is pure elementwise VPU adds.
        rows = sq.reshape(tm // 8, 8, d).sum(axis=0)          # (8, d)
        if not fold_lanes:
            return rows
        # Lane fold: aligned 128-wide static slices + VPU adds (no relayout).
        acc = rows[:, 0:128]
        for g in range(1, d // 128):
            acc = acc + rows[:, g * 128:(g + 1) * 128]
        return acc                                             # (8, 128)

    def write(val):
        if accumulate:
            out_ref[...] += val
        else:
            out_ref[...] = val

    if n_rows % tm == 0:
        # No padded rows anywhere: single write path.
        write(fold(diff))
    else:
        # Only the final grid step can contain padded rows.
        @pl.when(i < last)
        def _full():
            write(fold(diff))

        @pl.when(i == last)
        def _masked():
            # Narrow (tm, 1) sublane iota, broadcast in the compare.
            row = jax.lax.broadcasted_iota(jnp.int32, (tm, 1), 0) + i * tm
            write(fold(jnp.where(row < n_rows, diff, 0.0)))


@functools.partial(jax.jit,
                   static_argnames=("tm", "accumulate", "vmem_limit_bytes"))
def _loss_impl(hat_p, p, *, tm: int, accumulate: bool, vmem_limit_bytes: int):
    n, d = hat_p.shape
    grid = pl.cdiv(n, tm)
    fold_lanes = (d % 128 == 0)
    out_w = 128 if fold_lanes else d
    out_rows = 8 if accumulate else grid * 8

    kernel = functools.partial(_loss_kernel, n_rows=n, tm=tm,
                               fold_lanes=fold_lanes, accumulate=accumulate)

    if accumulate:
        out_spec = pl.BlockSpec((8, out_w), lambda i: (0, 0))
        semantics = ("arbitrary",)        # output resident across the grid
    else:
        out_spec = pl.BlockSpec((8, out_w), lambda i: (i, 0))
        semantics = ("parallel",)         # independent per-step partials

    partials = pl.pallas_call(
        kernel,
        out_shape=jax.ShapeDtypeStruct((out_rows, out_w), jnp.float32),
        grid_spec=pltpu.PrefetchScalarGridSpec(
            num_scalar_prefetch=0,
            grid=(grid,),
            in_specs=[
                pl.BlockSpec((tm, d), lambda i: (i, 0)),
                pl.BlockSpec((tm, d), lambda i: (i, 0)),
            ],
            out_specs=out_spec,
        ),
        compiler_params=pltpu.CompilerParams(
            dimension_semantics=semantics,
            vmem_limit_bytes=vmem_limit_bytes,
        ),
    )(hat_p, p)

    # Tiny finishing reduce (at most grid*8*128 f32) + mean over the batch.
    return jnp.sum(partials) / jnp.float32(n)


def random_effects_loss(hat_p: jax.Array, p: jax.Array, *,
                        max_tile_rows: int | None = None) -> jax.Array:
    assert hat_p.shape == p.shape and hat_p.ndim == 2
    n, d = hat_p.shape
    itemsize = max(jnp.dtype(hat_p.dtype).itemsize, jnp.dtype(p.dtype).itemsize)
    n_pad8 = ((n + 7) // 8) * 8

    # ---- per-generation VMEM budget --------------------------------------
    vmem_cap = _tpu_vmem_capacity_bytes()
    small_vmem = vmem_cap < (96 << 20)            # v7x (64 MiB) or unknown
    vmem_limit = (32 << 20) if small_vmem else (64 << 20)   # v5e/v6e: 64 MiB

    fold_lanes = (d % 128 == 0)
    out_w = 128 if fold_lanes else d

    # Per-row VMEM footprint:
    #   2 inputs x 2 pipeline buffers x itemsize           -> 4*itemsize*d
    #   f32 upcast copies of both tiles (narrow dtypes)    -> 8*d
    #   diff + sq f32 temporaries                          -> 8*d
    upcast = 8 if itemsize < 4 else 0
    per_row = d * (4 * itemsize + upcast + 8)
    fixed = 2 * 8 * out_w * 4 + (256 << 10)       # output double-buffer + slack

    # If even an 8-row tile blows 3/4 of the limit (huge D), raise the limit
    # toward physical capacity instead of failing to compile.
    min_need = 8 * per_row + fixed
    if min_need > (vmem_limit * 3) // 4:
        vmem_limit = max(32 << 20,
                         min((vmem_cap * 7) // 8, (min_need * 4) // 3))
    # TODO(synk): if D is so large that even that exceeds physical VMEM, add a
    # second grid axis over D in 128-lane blocks instead of one full-width tile.

    tm = ((vmem_limit * 3) // 4 - fixed) // per_row
    tm = max(8, (tm // 8) * 8)
    tm = min(tm, n_pad8)
    if max_tile_rows is not None:                 # test / tuning override
        tm = min(tm, max(8, (max_tile_rows // 8) * 8))

    # v7x: ensure >= 2 grid steps so "parallel" shards the stream across both
    # TensorCores (only when there is real data to move).
    prefer_multicore = (small_vmem and n_pad8 >= 16
                        and 2 * n * d * itemsize >= (4 << 20))
    if prefer_multicore:
        half = ((n_pad8 // 2 + 7) // 8) * 8
        tm = min(tm, max(8, half))

    grid = pl.cdiv(n, tm)
    # Small grids: accumulate in-place (skip the extra reduce / HBM round-trip)
    # unless we deliberately split for megacore.
    accumulate = (grid <= 8) and not (prefer_multicore and grid >= 2)

    return _loss_impl(hat_p, p, tm=int(tm), accumulate=bool(accumulate),
                      vmem_limit_bytes=int(vmem_limit))


if __name__ == "__main__":
    key = jax.random.PRNGKey(0)
    k1, k2 = jax.random.split(key)

    def ref_loss(a, b):
        return jnp.mean(jnp.sum((a - b) ** 2, axis=1))

    # 1) Small aligned shape (batch, features) — accumulate path, lane fold.
    N, D = 16, 128
    hp = jax.random.normal(k1, (N, D), dtype=jnp.float32)
    pp = jax.random.normal(k2, (N, D), dtype=jnp.float32)
    out = random_effects_loss(hp, pp)
    jax.block_until_ready(out)
    assert jnp.allclose(out, ref_loss(hp, pp), rtol=1e-5, atol=1e-5), \
        (out, ref_loss(hp, pp))

    # 2) Ragged batch (N not a multiple of 8) — masked final step.
    hp2 = jax.random.normal(k1, (13, D), dtype=jnp.float32)
    pp2 = jax.random.normal(k2, (13, D), dtype=jnp.float32)
    out2 = random_effects_loss(hp2, pp2)
    jax.block_until_ready(out2)
    assert jnp.allclose(out2, ref_loss(hp2, pp2), rtol=1e-5, atol=1e-5), \
        (out2, ref_loss(hp2, pp2))

    # 3) Multi-step accumulate path (forced small tiles), ragged last tile.
    hp3 = jax.random.normal(k1, (39, D), dtype=jnp.float32)
    pp3 = jax.random.normal(k2, (39, D), dtype=jnp.float32)
    out3 = random_effects_loss(hp3, pp3, max_tile_rows=8)
    jax.block_until_ready(out3)
    assert jnp.allclose(out3, ref_loss(hp3, pp3), rtol=1e-5, atol=1e-5), \
        (out3, ref_loss(hp3, pp3))

    # 4) Parallel per-step-partials path (grid > 8), ragged last tile.
    hp4 = jax.random.normal(k1, (100, D), dtype=jnp.float32)
    pp4 = jax.random.normal(k2, (100, D), dtype=jnp.float32)
    out4 = random_effects_loss(hp4, pp4, max_tile_rows=8)
    jax.block_until_ready(out4)
    assert jnp.allclose(out4, ref_loss(hp4, pp4), rtol=1e-5, atol=1e-5), \
        (out4, ref_loss(hp4, pp4))

    # 5) Feature dim not a multiple of 128 — no lane fold, (8, D) partials.
    hp5 = jax.random.normal(k1, (16, 96), dtype=jnp.float32)
    pp5 = jax.random.normal(k2, (16, 96), dtype=jnp.float32)
    out5 = random_effects_loss(hp5, pp5)
    jax.block_until_ready(out5)
    assert jnp.allclose(out5, ref_loss(hp5, pp5), rtol=1e-5, atol=1e-5), \
        (out5, ref_loss(hp5, pp5))

    print("KERNEL_OK")
</pallas_src>

<mosaic_0001>
module attributes {stable_mosaic.version = 11 : i64} {
  func.func @_loss_kernel(%arg0: i32, %arg1: memref<16x128xf32, #tpu.memory_space<vmem>>, %arg2: memref<16x128xf32, #tpu.memory_space<vmem>>, %arg3: memref<8x128xf32, #tpu.memory_space<vmem>>) attributes {dimension_semantics = [#tpu.dimension_semantics<arbitrary>], iteration_bounds = array<i64: 1>, scalar_prefetch = 0 : i64, scratch_operands = 0 : i64, tpu.core_type = #tpu.core_type<tc>, window_params = [{transform_indices = @transform_0, window_bounds = array<i64: 16, 128>}, {transform_indices = @transform_1, window_bounds = array<i64: 16, 128>}, {pipeline_mode = #tpu.pipeline_mode<synchronous>, transform_indices = @transform_2, window_bounds = array<i64: 8, 128>}]} {
    %c0_i32 = arith.constant 0 : i32
    %0 = arith.cmpi eq, %arg0, %c0_i32 : i32
    %1 = arith.extui %0 : i1 to i32
    %c0_i32_0 = arith.constant 0 : i32
    %2 = arith.cmpi ne, %1, %c0_i32_0 : i32
    scf.if %2 {
      %cst_8 = arith.constant 0.000000e+00 : f32
      %12 = vector.broadcast %cst_8 : f32 to vector<8x128xf32>
      %c0_9 = arith.constant 0 : index
      %c0_10 = arith.constant 0 : index
      %13 = vector.load %arg3[%c0_9, %c0_10] : memref<8x128xf32, #tpu.memory_space<vmem>>, vector<8x128xf32>
      tpu.vector_store %arg3[%c0_9, %c0_10], %12 {strides = array<i32>} : memref<8x128xf32, #tpu.memory_space<vmem>>, vector<8x128xf32>,
    } else {
    }
    %c0 = arith.constant 0 : index
    %c0_1 = arith.constant 0 : index
    %3 = vector.load %arg1[%c0, %c0_1] : memref<16x128xf32, #tpu.memory_space<vmem>>, vector<16x128xf32>
    %c0_2 = arith.constant 0 : index
    %c0_3 = arith.constant 0 : index
    %4 = vector.load %arg2[%c0_2, %c0_3] : memref<16x128xf32, #tpu.memory_space<vmem>>, vector<16x128xf32>
    %5 = arith.subf %3, %4 : vector<16x128xf32>
    %6 = arith.mulf %5, %5 : vector<16x128xf32>
    %7 = vector.shape_cast %6 : vector<16x128xf32> to vector<2x8x128xf32>
    %cst = arith.constant dense<0.000000e+00> : vector<8x128xf32>
    %8 = vector.multi_reduction <add>, %7, %cst [0] : vector<2x8x128xf32> to vector<8x128xf32>
    %c0_4 = arith.constant 0 : index
    %c0_5 = arith.constant 0 : index
    %9 = vector.load %arg3[%c0_4, %c0_5] : memref<8x128xf32, #tpu.memory_space<vmem>>, vector<8x128xf32>
    %10 = arith.addf %9, %8 : vector<8x128xf32>
    %c0_6 = arith.constant 0 : index
    %c0_7 = arith.constant 0 : index
    %11 = vector.load %arg3[%c0_6, %c0_7] : memref<8x128xf32, #tpu.memory_space<vmem>>, vector<8x128xf32>
    tpu.vector_store %arg3[%c0_6, %c0_7], %10 {strides = array<i32>} : memref<8x128xf32, #tpu.memory_space<vmem>>, vector<8x128xf32>,
    return
  }
  func.func @transform_0(%arg0: i32) -> (i32, i32) {
    %c0_i32 = arith.constant 0 : i32
    %c0_i32_0 = arith.constant 0 : i32
    return %arg0, %c0_i32 : i32, i32
  }
  func.func @transform_1(%arg0: i32) -> (i32, i32) {
    %c0_i32 = arith.constant 0 : i32
    %c0_i32_0 = arith.constant 0 : i32
    return %arg0, %c0_i32 : i32, i32
  }
  func.func @transform_2(%arg0: i32) -> (i32, i32) {
    %c0_i32 = arith.constant 0 : i32
    %c0_i32_0 = arith.constant 0 : i32
    %c0_i32_1 = arith.constant 0 : i32
    return %c0_i32, %c0_i32_0 : i32, i32
  }
}

</mosaic_0001>

<bundles_post_ra>
// kernel: _loss_impl.1
= control target key start
LH: loop header
LB: loop body
LE: loop exit
PB: predicated region body
PF: predicated region fallthrough
CT: control target
= control target key end

     0   :  { %7 = vsyncpa [#allocation3], 0  ;;  %s151_s0 = inlined_call_operand.hbm [shape: f32[16,128], index: 0, kind: input, shape index: {}]   ;;  %s152_s1 = inlined_call_operand.hbm [shape: f32[16,128], index: 1, kind: input, shape index: {}]   ;;  %s153_s2 = inlined_call_operand.vmem [shape: f32[8,128], index: 2, kind: output, shape index: {}]  }
   0x1   :  { %s13_s11 = sshll.u32 %s151_s0, 4  ;;  %s14_s11 = int_to_ptr.hbm [resolvable:$true] %s13_s11 }
   0x2   :  { %8 = vsyncpa [#allocation5], 0  ;;  %s123_s12 = smov [#allocation2]   ;;  %s26_s16 = sshll.u32 %s152_s1, 4  ;;  %s27_s16 = int_to_ptr.hbm [resolvable:$true] %s26_s16 }
   0x3   :  { %s15_s13 = sshll.u32 %s123_s12, 4  ;;  %s124_s17 = smov 128   ;;  %s16_s13 = int_to_ptr.vmem [resolvable:$true] %s15_s13 }
   0x4   :  { %s125_s18 = smov 8   ;;  %s126_s19 = smov [#allocation4]  }
   0x5   :  { %21 = dma.hbm_to_vmem [thread:$0]  %s14_s11, 256, %s16_s13, [#allocation3], %s124_s17, %s124_s17, %s125_s18  }
   0x6   :  { %s28_s20 = sshll.u32 %s126_s19, 4  ;;  %s29_s20 = int_to_ptr.vmem [resolvable:$true] %s28_s20 }
   0x7   :  { %34 = dma.hbm_to_vmem [thread:$0]  %s27_s16, 256, %s29_s20, [#allocation5], %s124_s17, %s124_s17, %s125_s18  }
   0x8   :  { %119 = dma.done.wait [#allocation3], 256  }
   0x9   :  { %120 = vsyncadd [#allocation3], 4294967040 }
   0xa   :  { %121 = dma.done.wait [#allocation5], 256  }
   0xb   :  { %122 = vsyncadd [#allocation5], 4294967040  ;;  %v48_v0 = vld [vmem:[#allocation2] sm:$0xff]  ;;  %v49_v1 = vld [vmem:[#allocation2 + $0x8] sm:$0xff] }
   0xc   :  { %v50_v2 = vld [vmem:[#allocation4] sm:$0xff]  ;;  %v51_v3 = vld [vmem:[#allocation4 + $0x8] sm:$0xff] }
   0xd   :  { %v52_v4 = vsub.f32 %v48_v0, %v50_v2  ;;  %v53_v5 = vsub.f32 %v49_v1, %v51_v3 }
   0xf   :  { %v54_v6 = vmul.f32 %v52_v4, %v52_v4  ;;  %v55_v7 = vmul.f32 %v53_v5, %v53_v5 }
  0x11   :  { %v56_v8 = vadd.f32 %v55_v7, %v54_v6 }
  0x13   :  { %59 = vst [vmem:[%s153_s2] sm:$0xff] %v56_v8 }
  0x14   :  { %64 = vsyncpa [#allocation3], 1 }
  0x15   :  { %65 = vsyncpa [#allocation5], 1 }

</bundles_post_ra>
